<compile_context>
chip_gen: v5e
topology: v5e:2x2
jax: 0.10.0
libtpu: 0.0.40
codegen_flags: <defaults>
</compile_context>

<pallas_src>
import functools

import jax
import jax.numpy as jnp
from jax.experimental import pallas as pl
from jax.experimental.pallas import tpu as pltpu

# Hidden sizes from the module defaults (h1..h4 are the ones actually used).
H1, H2, H3, H4 = 16, 32, 64, 128


# ---------------------------------------------------------------------------
# Kernel: fused block-diagonal MLP chain + off-MXU epilogue.
# ---------------------------------------------------------------------------
def _fused_mlp_kernel(xn_ref, xl_ref,
                      w1n, w1l, b1, w2, b2, w3, b3, w4, b4, w5, b5,
                      out_ref):
    cdt = w1n.dtype                                   # bf16 (default) or f32

    xn = xn_ref[...].astype(cdt)
    xl = xl_ref[...].astype(cdt)

    # Layer 1 (block-diagonal) as a sum of two zero-padded dots: no in-kernel
    # lane concat of the raw inputs is needed, accumulation stays f32.
    y = (jnp.dot(xn, w1n[...], preferred_element_type=jnp.float32)
         + jnp.dot(xl, w1l[...], preferred_element_type=jnp.float32)
         + b1[...])
    x = jnp.maximum(y, 0.0).astype(cdt)

    # Layers 2-3: fused block-diagonal matmuls (MXU, f32 accumulation).
    for w_ref, b_ref in ((w2, b2), (w3, b3)):
        y = jnp.dot(x, w_ref[...], preferred_element_type=jnp.float32) + b_ref[...]
        x = jnp.maximum(y, 0.0).astype(cdt)

    # Layer 4: last MXU layer; keep its activation in f32 for the epilogue.
    y = jnp.dot(x, w4[...], preferred_element_type=jnp.float32) + b4[...]
    x4 = jnp.maximum(y, 0.0)                          # (tile_b, 2*H4) f32

    # Layer 5 + mean-over-node_out + regression, OFF the MXU:
    #   col0 = mean_j(node_embedding_j) = x4[:, :H4] . w5[:, :H4] + b5[0]
    #   col1 = layer_embedding @ reg_w  = x4[:, H4:] . w5[:, H4:] + b5[1]
    # VPU multiply (sublane-broadcast weight row) + XLU lane reduce.
    w5v = w5[...]                                     # (1, 2*H4) f32
    b5v = b5[...]                                     # (1, 2)    f32
    p = x4 * w5v
    col0 = jnp.sum(p[:, :H4], axis=-1, keepdims=True) + b5v[:, 0:1]
    col1 = jnp.sum(p[:, H4:], axis=-1, keepdims=True) + b5v[:, 1:2]
    out_ref[...] = col0 * col1                        # (tile_b, 1)


# ---------------------------------------------------------------------------
# Parameter preparation: block-diagonal fusion + mean / regression folding.
# ---------------------------------------------------------------------------
def _blockdiag(a, b):
    m1, n1 = a.shape
    m2, n2 = b.shape
    out = jnp.zeros((m1 + m2, n1 + n2), jnp.float32)
    return out.at[:m1, :n1].set(a).at[m1:, n1:].set(b)


def prepare_fused_params(params, *, use_bf16=True):
    """Returns the flat kernel parameter list
       [w1n, w1l, b1, w2, b2, w3, b3, w4, b4, w5, b5]."""
    hi = jax.lax.Precision.HIGHEST
    node, layer, rw = params["node"], params["layer"], params["reg"]
    node_out = node[-1][0].shape[1]
    wdt = jnp.bfloat16 if use_bf16 else jnp.float32

    (nw1, nb1), (lw1, lb1) = node[0], layer[0]
    node_in, layer_in = nw1.shape[0], lw1.shape[0]
    # Zero-padded layer-1 weights so y1 = xn@w1n + xl@w1l + b1 reproduces the
    # block-diagonal first layer exactly.
    w1n = jnp.zeros((node_in, 2 * H1), jnp.float32).at[:, :H1].set(nw1)
    w1l = jnp.zeros((layer_in, 2 * H1), jnp.float32).at[:, H1:].set(lw1)
    b1 = jnp.concatenate([nb1, lb1], axis=1)

    ws = [_blockdiag(node[i][0], layer[i][0]) for i in (1, 2, 3)]
    bs = [jnp.concatenate([node[i][1], layer[i][1]], axis=1) for i in (1, 2, 3)]

    # Fold mean (over node_out) and regression weight into layer 5 (exact:
    # the final layers have no activation).
    (nw5, nb5), (lw5, lb5) = node[4], layer[4]
    mean_vec = jnp.full((node_out, 1), 1.0 / node_out, jnp.float32)
    w5 = jnp.concatenate([jnp.dot(nw5, mean_vec, precision=hi),
                          jnp.dot(lw5, rw, precision=hi)], axis=0).T     # (1, 2*H4)
    b5 = jnp.concatenate([jnp.dot(nb5, mean_vec, precision=hi),
                          jnp.dot(lb5, rw, precision=hi)], axis=1)       # (1, 2)

    mxu_ws = [w.astype(wdt) for w in (w1n, w1l)] + [w.astype(wdt) for w in ws]
    f32_bs = [b.astype(jnp.float32) for b in (b1, *bs)]
    # kernel-argument order
    return [mxu_ws[0], mxu_ws[1], f32_bs[0],
            mxu_ws[2], f32_bs[1], mxu_ws[3], f32_bs[2], mxu_ws[4], f32_bs[3],
            w5.astype(jnp.float32), b5.astype(jnp.float32)]


# ---------------------------------------------------------------------------
# Wrapper: batch-parallel grid with resident weights.
# ---------------------------------------------------------------------------
def _round_up(x, m):
    return ((x + m - 1) // m) * m


@functools.partial(jax.jit, static_argnames=("tile_b", "use_bf16"))
def node_layer_embedding_forward(node_x, layer_x, params, *,
                                 tile_b=1024, use_bf16=True):
    """node_x: (B, node_in), layer_x: (B, layer_in).
    params: dict with 'node'/'layer' = five (W, b) pairs stored as
    (in, out) / (1, out) (transpose of PyTorch) and 'reg' = (node_out, 1).
    use_bf16=True is the fast MXU-native path; f32 is the slow path."""
    kernel_params = prepare_fused_params(params, use_bf16=use_bf16)

    B, node_in = node_x.shape
    layer_in = layer_x.shape[1]

    # tile_b: always a multiple of 8 (f32 sublane); capped so the grid has
    # >= 2 steps whenever B allows it (v7x megacore).  Default 1024 keeps the
    # per-step VMEM (incl. 128-lane padding and double buffers) well under the
    # v5e 16 MiB scoped default; sweep 1024-4096 on v6e/v7x for huge batches.
    half = _round_up(max((B + 1) // 2, 8), 8)
    tile_b = _round_up(max(min(tile_b, half), 8), 8)
    b_pad = _round_up(B, tile_b)
    if b_pad != B:
        node_x = jnp.pad(node_x, ((0, b_pad - B), (0, 0)))
        layer_x = jnp.pad(layer_x, ((0, b_pad - B), (0, 0)))

    in_specs = [pl.BlockSpec((tile_b, node_in), lambda i: (i, 0)),
                pl.BlockSpec((tile_b, layer_in), lambda i: (i, 0))]
    # Constant index_map -> each weight/bias is DMA'd once and stays resident
    # in VMEM across all grid steps.  (pipeline_mode=pl.Buffered(1) could drop
    # the redundant second buffer, but VMEM is nowhere near a constraint.)
    in_specs += [pl.BlockSpec(p.shape, lambda i: (0, 0)) for p in kernel_params]

    flops = 2 * b_pad * (node_in * 2 * H1 + layer_in * 2 * H1
                         + 2 * H1 * 2 * H2 + 2 * H2 * 2 * H3
                         + 2 * H3 * 2 * H4 + 2 * H4)
    bytes_accessed = (b_pad * (node_in + layer_in + 1) * 4
                      + sum(int(p.size) * p.dtype.itemsize for p in kernel_params))

    out = pl.pallas_call(
        _fused_mlp_kernel,
        out_shape=jax.ShapeDtypeStruct((b_pad, 1), jnp.float32),
        grid=(b_pad // tile_b,),
        in_specs=in_specs,
        # Output kept (tile_b, 1): a lane-dense (tile_b//128, 128) layout would
        # require an in-kernel sublane->lane relayout of the reduced column;
        # the payload is only 4 B/row, so the masked stores are far off the
        # MXU-bound critical path.
        out_specs=pl.BlockSpec((tile_b, 1), lambda i: (i, 0)),
        compiler_params=pltpu.CompilerParams(
            dimension_semantics=("parallel",)),          # v7x: 2 TCs share batch
        cost_estimate=pl.CostEstimate(flops=int(flops), transcendentals=0,
                                      bytes_accessed=int(bytes_accessed)),
    )(node_x, layer_x, *kernel_params)
    return out[:B]


# ---------------------------------------------------------------------------
# Parameter init + pure-JAX reference (mirrors the PyTorch forward).
# ---------------------------------------------------------------------------
def init_params(key, node_in, node_out, layer_in, layer_out):
    assert node_out == layer_out, "regression requires node_out == layer_out"

    def linear(key, fan_in, fan_out):
        kw, kb = jax.random.split(key)
        s = 1.0 / jnp.sqrt(fan_in)
        w = jax.random.uniform(kw, (fan_in, fan_out), jnp.float32, -s, s)
        b = jax.random.uniform(kb, (1, fan_out), jnp.float32, -s, s)
        return w, b

    node_dims = [node_in, H1, H2, H3, H4, node_out]
    layer_dims = [layer_in, H1, H2, H3, H4, layer_out]
    keys = jax.random.split(key, 11)
    node_params = [linear(keys[i], node_dims[i], node_dims[i + 1]) for i in range(5)]
    layer_params = [linear(keys[5 + i], layer_dims[i], layer_dims[i + 1]) for i in range(5)]
    s = 1.0 / jnp.sqrt(node_out)
    reg_w = jax.random.uniform(keys[10], (node_out, 1), jnp.float32, -s, s)
    return {"node": node_params, "layer": layer_params, "reg": reg_w}


def reference_forward(node_x, layer_x, params):
    hi = jax.lax.Precision.HIGHEST

    def mlp(x, ps):
        for i, (w, b) in enumerate(ps):
            x = jnp.dot(x, w, precision=hi) + b
            if i < len(ps) - 1:
                x = jnp.maximum(x, 0.0)
        return x

    node_y = mlp(node_x, params["node"])[:, :, None]      # (B, node_out, 1)
    layer_y = mlp(layer_x, params["layer"])[:, None, :]   # (B, 1, layer_out)
    y = jnp.matmul(node_y, layer_y, precision=hi)         # (B, node_out, layer_out)
    y = jnp.mean(y, axis=1)                                # (B, layer_out)
    return jnp.dot(y, params["reg"], precision=hi)         # (B, 1)


if __name__ == "__main__":
    key = jax.random.PRNGKey(0)
    k_params, k_nx, k_lx = jax.random.split(key, 3)

    node_in, node_out = 8, 32
    layer_in, layer_out = 12, 32
    params = init_params(k_params, node_in, node_out, layer_in, layer_out)

    def rel_err(a, b):
        return float(jnp.max(jnp.abs(a - b)) / (jnp.max(jnp.abs(b)) + 1e-6))

    # --- small batch (two grid steps of 8 rows) ------------------------------
    B = 16
    node_x = jax.random.normal(k_nx, (B, node_in), jnp.float32)
    layer_x = jax.random.normal(k_lx, (B, layer_in), jnp.float32)
    ref = jax.block_until_ready(reference_forward(node_x, layer_x, params))

    out_bf16 = jax.block_until_ready(
        node_layer_embedding_forward(node_x, layer_x, params))        # bf16 default
    assert out_bf16.shape == (B, 1)
    assert rel_err(out_bf16, ref) < 8e-2, rel_err(out_bf16, ref)

    out_f32 = jax.block_until_ready(
        node_layer_embedding_forward(node_x, layer_x, params, use_bf16=False))
    assert out_f32.shape == (B, 1)
    assert rel_err(out_f32, ref) < 2e-2, rel_err(out_f32, ref)

    # --- larger ragged batch: padding + multi-step grid ----------------------
    B2 = 200
    k_nx2, k_lx2 = jax.random.split(jax.random.PRNGKey(1))
    node_x2 = jax.random.normal(k_nx2, (B2, node_in), jnp.float32)
    layer_x2 = jax.random.normal(k_lx2, (B2, layer_in), jnp.float32)
    ref2 = jax.block_until_ready(reference_forward(node_x2, layer_x2, params))

    out2 = jax.block_until_ready(
        node_layer_embedding_forward(node_x2, layer_x2, params))      # bf16 default
    assert out2.shape == (B2, 1)
    assert rel_err(out2, ref2) < 8e-2, rel_err(out2, ref2)

    # Non-multiple-of-8 user tile is clamped (correctness concern from review).
    out2_f32 = jax.block_until_ready(
        node_layer_embedding_forward(node_x2, layer_x2, params,
                                     use_bf16=False, tile_b=100))
    assert out2_f32.shape == (B2, 1)
    assert rel_err(out2_f32, ref2) < 2e-2, rel_err(out2_f32, ref2)

    print("KERNEL_OK")
</pallas_src>

<mosaic_0001>
module attributes {stable_mosaic.version = 11 : i64} {
  func.func @_fused_mlp_kernel(%arg0: i32, %arg1: memref<8x8xf32, #tpu.memory_space<vmem>>, %arg2: memref<8x12xf32, #tpu.memory_space<vmem>>, %arg3: memref<8x32xbf16, #tpu.memory_space<vmem>>, %arg4: memref<12x32xbf16, #tpu.memory_space<vmem>>, %arg5: memref<1x32xf32, #tpu.memory_space<vmem>>, %arg6: memref<32x64xbf16, #tpu.memory_space<vmem>>, %arg7: memref<1x64xf32, #tpu.memory_space<vmem>>, %arg8: memref<64x128xbf16, #tpu.memory_space<vmem>>, %arg9: memref<1x128xf32, #tpu.memory_space<vmem>>, %arg10: memref<128x256xbf16, #tpu.memory_space<vmem>>, %arg11: memref<1x256xf32, #tpu.memory_space<vmem>>, %arg12: memref<1x256xf32, #tpu.memory_space<vmem>>, %arg13: memref<1x2xf32, #tpu.memory_space<vmem>>, %arg14: memref<8x1xf32, #tpu.memory_space<vmem>>) attributes {dimension_semantics = [#tpu.dimension_semantics<parallel>], iteration_bounds = array<i64: 2>, scalar_prefetch = 0 : i64, scratch_operands = 0 : i64, tpu.core_type = #tpu.core_type<tc>, window_params = [{transform_indices = @transform_0, window_bounds = array<i64: 8, 8>}, {transform_indices = @transform_1, window_bounds = array<i64: 8, 12>}, {pipeline_mode = #tpu.pipeline_mode<synchronous>, transform_indices = @transform_2, window_bounds = array<i64: 8, 32>}, {pipeline_mode = #tpu.pipeline_mode<synchronous>, transform_indices = @transform_3, window_bounds = array<i64: 12, 32>}, {pipeline_mode = #tpu.pipeline_mode<synchronous>, transform_indices = @transform_4, window_bounds = array<i64: 1, 32>}, {pipeline_mode = #tpu.pipeline_mode<synchronous>, transform_indices = @transform_5, window_bounds = array<i64: 32, 64>}, {pipeline_mode = #tpu.pipeline_mode<synchronous>, transform_indices = @transform_6, window_bounds = array<i64: 1, 64>}, {pipeline_mode = #tpu.pipeline_mode<synchronous>, transform_indices = @transform_7, window_bounds = array<i64: 64, 128>}, {pipeline_mode = #tpu.pipeline_mode<synchronous>, transform_indices = @transform_8, window_bounds = array<i64: 1, 128>}, {pipeline_mode = #tpu.pipeline_mode<synchronous>, transform_indices = @transform_9, window_bounds = array<i64: 128, 256>}, {pipeline_mode = #tpu.pipeline_mode<synchronous>, transform_indices = @transform_10, window_bounds = array<i64: 1, 256>}, {pipeline_mode = #tpu.pipeline_mode<synchronous>, transform_indices = @transform_11, window_bounds = array<i64: 1, 256>}, {pipeline_mode = #tpu.pipeline_mode<synchronous>, transform_indices = @transform_12, window_bounds = array<i64: 1, 2>}, {transform_indices = @transform_13, window_bounds = array<i64: 8, 1>}]} {
    %c0 = arith.constant 0 : index
    %c0_0 = arith.constant 0 : index
    %0 = vector.load %arg1[%c0, %c0_0] : memref<8x8xf32, #tpu.memory_space<vmem>>, vector<8x8xf32>
    %1 = arith.truncf %0 : vector<8x8xf32> to vector<8x8xbf16>
    %c0_1 = arith.constant 0 : index
    %c0_2 = arith.constant 0 : index
    %2 = vector.load %arg2[%c0_1, %c0_2] : memref<8x12xf32, #tpu.memory_space<vmem>>, vector<8x12xf32>
    %3 = arith.truncf %2 : vector<8x12xf32> to vector<8x12xbf16>
    %c0_3 = arith.constant 0 : index
    %c0_4 = arith.constant 0 : index
    %4 = vector.load %arg3[%c0_3, %c0_4] : memref<8x32xbf16, #tpu.memory_space<vmem>>, vector<8x32xbf16>
    %cst = arith.constant dense<0.000000e+00> : vector<8x32xf32>
    %5 = tpu.matmul %1, %4, %cst {dimension_numbers = #tpu.dot_dimension_numbers<[1], [0], [0], [1], [0, 0, 1, 1], [], []>} : vector<8x8xbf16>, vector<8x32xbf16>, vector<8x32xf32> -> vector<8x32xf32>
    %c0_5 = arith.constant 0 : index
    %c0_6 = arith.constant 0 : index
    %6 = vector.load %arg4[%c0_5, %c0_6] : memref<12x32xbf16, #tpu.memory_space<vmem>>, vector<12x32xbf16>
    %cst_7 = arith.constant dense<0.000000e+00> : vector<8x32xf32>
    %7 = tpu.matmul %3, %6, %cst_7 {dimension_numbers = #tpu.dot_dimension_numbers<[1], [0], [0], [1], [0, 0, 1, 1], [], []>} : vector<8x12xbf16>, vector<12x32xbf16>, vector<8x32xf32> -> vector<8x32xf32>
    %8 = arith.addf %5, %7 : vector<8x32xf32>
    %c0_8 = arith.constant 0 : index
    %c0_9 = arith.constant 0 : index
    %9 = vector.load %arg5[%c0_8, %c0_9] : memref<1x32xf32, #tpu.memory_space<vmem>>, vector<1x32xf32>
    %10 = vector.broadcast %9 : vector<1x32xf32> to vector<8x32xf32>
    %11 = arith.addf %8, %10 : vector<8x32xf32>
    %cst_10 = arith.constant 0.000000e+00 : f32
    %12 = vector.broadcast %cst_10 : f32 to vector<8x32xf32>
    %13 = arith.maximumf %11, %12 : vector<8x32xf32>
    %14 = arith.truncf %13 : vector<8x32xf32> to vector<8x32xbf16>
    %c0_11 = arith.constant 0 : index
    %c0_12 = arith.constant 0 : index
    %15 = vector.load %arg6[%c0_11, %c0_12] : memref<32x64xbf16, #tpu.memory_space<vmem>>, vector<32x64xbf16>
    %cst_13 = arith.constant dense<0.000000e+00> : vector<8x64xf32>
    %16 = tpu.matmul %14, %15, %cst_13 {dimension_numbers = #tpu.dot_dimension_numbers<[1], [0], [0], [1], [0, 0, 1, 1], [], []>} : vector<8x32xbf16>, vector<32x64xbf16>, vector<8x64xf32> -> vector<8x64xf32>
    %c0_14 = arith.constant 0 : index
    %c0_15 = arith.constant 0 : index
    %17 = vector.load %arg7[%c0_14, %c0_15] : memref<1x64xf32, #tpu.memory_space<vmem>>, vector<1x64xf32>
    %18 = vector.broadcast %17 : vector<1x64xf32> to vector<8x64xf32>
    %19 = arith.addf %16, %18 : vector<8x64xf32>
    %cst_16 = arith.constant 0.000000e+00 : f32
    %20 = vector.broadcast %cst_16 : f32 to vector<8x64xf32>
    %21 = arith.maximumf %19, %20 : vector<8x64xf32>
    %22 = arith.truncf %21 : vector<8x64xf32> to vector<8x64xbf16>
    %c0_17 = arith.constant 0 : index
    %c0_18 = arith.constant 0 : index
    %23 = vector.load %arg8[%c0_17, %c0_18] : memref<64x128xbf16, #tpu.memory_space<vmem>>, vector<64x128xbf16>
    %cst_19 = arith.constant dense<0.000000e+00> : vector<8x128xf32>
    %24 = tpu.matmul %22, %23, %cst_19 {dimension_numbers = #tpu.dot_dimension_numbers<[1], [0], [0], [1], [0, 0, 1, 1], [], []>} : vector<8x64xbf16>, vector<64x128xbf16>, vector<8x128xf32> -> vector<8x128xf32>
    %c0_20 = arith.constant 0 : index
    %c0_21 = arith.constant 0 : index
    %25 = vector.load %arg9[%c0_20, %c0_21] : memref<1x128xf32, #tpu.memory_space<vmem>>, vector<1x128xf32>
    %26 = vector.broadcast %25 : vector<1x128xf32> to vector<8x128xf32>
    %27 = arith.addf %24, %26 : vector<8x128xf32>
    %cst_22 = arith.constant 0.000000e+00 : f32
    %28 = vector.broadcast %cst_22 : f32 to vector<8x128xf32>
    %29 = arith.maximumf %27, %28 : vector<8x128xf32>
    %30 = arith.truncf %29 : vector<8x128xf32> to vector<8x128xbf16>
    %c0_23 = arith.constant 0 : index
    %c0_24 = arith.constant 0 : index
    %31 = vector.load %arg10[%c0_23, %c0_24] : memref<128x256xbf16, #tpu.memory_space<vmem>>, vector<128x256xbf16>
    %cst_25 = arith.constant dense<0.000000e+00> : vector<8x256xf32>
    %32 = tpu.matmul %30, %31, %cst_25 {dimension_numbers = #tpu.dot_dimension_numbers<[1], [0], [0], [1], [0, 0, 1, 1], [], []>} : vector<8x128xbf16>, vector<128x256xbf16>, vector<8x256xf32> -> vector<8x256xf32>
    %c0_26 = arith.constant 0 : index
    %c0_27 = arith.constant 0 : index
    %33 = vector.load %arg11[%c0_26, %c0_27] : memref<1x256xf32, #tpu.memory_space<vmem>>, vector<1x256xf32>
    %34 = vector.broadcast %33 : vector<1x256xf32> to vector<8x256xf32>
    %35 = arith.addf %32, %34 : vector<8x256xf32>
    %cst_28 = arith.constant 0.000000e+00 : f32
    %36 = vector.broadcast %cst_28 : f32 to vector<8x256xf32>
    %37 = arith.maximumf %35, %36 : vector<8x256xf32>
    %c0_29 = arith.constant 0 : index
    %c0_30 = arith.constant 0 : index
    %38 = vector.load %arg12[%c0_29, %c0_30] : memref<1x256xf32, #tpu.memory_space<vmem>>, vector<1x256xf32>
    %c0_31 = arith.constant 0 : index
    %c0_32 = arith.constant 0 : index
    %39 = vector.load %arg13[%c0_31, %c0_32] : memref<1x2xf32, #tpu.memory_space<vmem>>, vector<1x2xf32>
    %40 = vector.broadcast %38 : vector<1x256xf32> to vector<8x256xf32>
    %41 = arith.mulf %37, %40 : vector<8x256xf32>
    %42 = vector.extract_strided_slice %41 {offsets = [0, 0], sizes = [8, 128], strides = [1, 1]} : vector<8x256xf32> to vector<8x128xf32>
    %cst_33 = arith.constant dense<0.000000e+00> : vector<8xf32>
    %43 = vector.multi_reduction <add>, %42, %cst_33 [1] : vector<8x128xf32> to vector<8xf32>
    %44 = vector.shape_cast %43 : vector<8xf32> to vector<8x1xf32>
    %45 = vector.extract_strided_slice %39 {offsets = [0, 0], sizes = [1, 1], strides = [1, 1]} : vector<1x2xf32> to vector<1x1xf32>
    %46 = vector.broadcast %45 : vector<1x1xf32> to vector<8x1xf32>
    %47 = arith.addf %44, %46 : vector<8x1xf32>
    %48 = vector.extract_strided_slice %41 {offsets = [0, 128], sizes = [8, 128], strides = [1, 1]} : vector<8x256xf32> to vector<8x128xf32>
    %cst_34 = arith.constant dense<0.000000e+00> : vector<8xf32>
    %49 = vector.multi_reduction <add>, %48, %cst_34 [1] : vector<8x128xf32> to vector<8xf32>
    %50 = vector.shape_cast %49 : vector<8xf32> to vector<8x1xf32>
    %51 = vector.extract_strided_slice %39 {offsets = [0, 1], sizes = [1, 1], strides = [1, 1]} : vector<1x2xf32> to vector<1x1xf32>
    %52 = vector.broadcast %51 : vector<1x1xf32> to vector<8x1xf32>
    %53 = arith.addf %50, %52 : vector<8x1xf32>
    %54 = arith.mulf %47, %53 : vector<8x1xf32>
    %c0_35 = arith.constant 0 : index
    %c0_36 = arith.constant 0 : index
    %55 = vector.load %arg14[%c0_35, %c0_36] : memref<8x1xf32, #tpu.memory_space<vmem>>, vector<8x1xf32>
    tpu.vector_store %arg14[%c0_35, %c0_36], %54 {strides = array<i32>} : memref<8x1xf32, #tpu.memory_space<vmem>>, vector<8x1xf32>,
    return
  }
  func.func @transform_0(%arg0: i32) -> (i32, i32) {
    %c0_i32 = arith.constant 0 : i32
    %c0_i32_0 = arith.constant 0 : i32
    return %arg0, %c0_i32 : i32, i32
  }
  func.func @transform_1(%arg0: i32) -> (i32, i32) {
    %c0_i32 = arith.constant 0 : i32
    %c0_i32_0 = arith.constant 0 : i32
    return %arg0, %c0_i32 : i32, i32
  }
  func.func @transform_2(%arg0: i32) -> (i32, i32) {
    %c0_i32 = arith.constant 0 : i32
    %c0_i32_0 = arith.constant 0 : i32
    %c0_i32_1 = arith.constant 0 : i32
    return %c0_i32, %c0_i32_0 : i32, i32
  }
  func.func @transform_3(%arg0: i32) -> (i32, i32) {
    %c0_i32 = arith.constant 0 : i32
    %c0_i32_0 = arith.constant 0 : i32
    %c0_i32_1 = arith.constant 0 : i32
    return %c0_i32, %c0_i32_0 : i32, i32
  }
  func.func @transform_4(%arg0: i32) -> (i32, i32) {
    %c0_i32 = arith.constant 0 : i32
    %c0_i32_0 = arith.constant 0 : i32
    %c0_i32_1 = arith.constant 0 : i32
    return %c0_i32, %c0_i32_0 : i32, i32
  }
  func.func @transform_5(%arg0: i32) -> (i32, i32) {
    %c0_i32 = arith.constant 0 : i32
    %c0_i32_0 = arith.constant 0 : i32
    %c0_i32_1 = arith.constant 0 : i32
    return %c0_i32, %c0_i32_0 : i32, i32
  }
  func.func @transform_6(%arg0: i32) -> (i32, i32) {
    %c0_i32 = arith.constant 0 : i32
    %c0_i32_0 = arith.constant 0 : i32
    %c0_i32_1 = arith.constant 0 : i32
    return %c0_i32, %c0_i32_0 : i32, i32
  }
  func.func @transform_7(%arg0: i32) -> (i32, i32) {
    %c0_i32 = arith.constant 0 : i32
    %c0_i32_0 = arith.constant 0 : i32
    %c0_i32_1 = arith.constant 0 : i32
    return %c0_i32, %c0_i32_0 : i32, i32
  }
  func.func @transform_8(%arg0: i32) -> (i32, i32) {
    %c0_i32 = arith.constant 0 : i32
    %c0_i32_0 = arith.constant 0 : i32
    %c0_i32_1 = arith.constant 0 : i32
    return %c0_i32, %c0_i32_0 : i32, i32
  }
  func.func @transform_9(%arg0: i32) -> (i32, i32) {
    %c0_i32 = arith.constant 0 : i32
    %c0_i32_0 = arith.constant 0 : i32
    %c0_i32_1 = arith.constant 0 : i32
    return %c0_i32, %c0_i32_0 : i32, i32
  }
  func.func @transform_10(%arg0: i32) -> (i32, i32) {
    %c0_i32 = arith.constant 0 : i32
    %c0_i32_0 = arith.constant 0 : i32
    %c0_i32_1 = arith.constant 0 : i32
    return %c0_i32, %c0_i32_0 : i32, i32
  }
  func.func @transform_11(%arg0: i32) -> (i32, i32) {
    %c0_i32 = arith.constant 0 : i32
    %c0_i32_0 = arith.constant 0 : i32
    %c0_i32_1 = arith.constant 0 : i32
    return %c0_i32, %c0_i32_0 : i32, i32
  }
  func.func @transform_12(%arg0: i32) -> (i32, i32) {
    %c0_i32 = arith.constant 0 : i32
    %c0_i32_0 = arith.constant 0 : i32
    %c0_i32_1 = arith.constant 0 : i32
    return %c0_i32, %c0_i32_0 : i32, i32
  }
  func.func @transform_13(%arg0: i32) -> (i32, i32) {
    %c0_i32 = arith.constant 0 : i32
    %c0_i32_0 = arith.constant 0 : i32
    return %arg0, %c0_i32 : i32, i32
  }
}

</mosaic_0001>

<bundles_post_ra>
// kernel: node_layer_embedding_forward.1
= control target key start
LH: loop header
LB: loop body
LE: loop exit
PB: predicated region body
PF: predicated region fallthrough
CT: control target
= control target key end

     0   :  { %s1050_s25 = smov 0   ;;  %s1216_s0 = inlined_call_operand.vmem [shape: f32[16,8], index: 0, kind: input, shape index: {}]   ;;  %s1217_s1 = inlined_call_operand.vmem [shape: f32[16,12], index: 1, kind: input, shape index: {}]   ;;  %s1218_s2 = inlined_call_operand.vmem [shape: bf16[8,32], index: 2, kind: input, shape index: {}]   ;;  %s1219_s3 = inlined_call_operand.vmem [shape: bf16[12,32], index: 3, kind: input, shape index: {}]   ;;  %s1220_s4 = inlined_call_operand.vmem [shape: f32[1,32], index: 4, kind: input, shape index: {}]   ;;  %s1221_s5 = inlined_call_operand.vmem [shape: bf16[32,64], index: 5, kind: input, shape index: {}]   ;;  %s1222_s6 = inlined_call_operand.vmem [shape: f32[1,64], index: 6, kind: input, shape index: {}]   ;;  %s1223_s7 = inlined_call_operand.vmem [shape: bf16[64,128], index: 7, kind: input, shape index: {}]   ;;  %s1224_s8 = inlined_call_operand.vmem [shape: f32[1,128], index: 8, kind: input, shape index: {}]   ;;  %s1225_s9 = inlined_call_operand.vmem [shape: bf16[128,256], index: 9, kind: input, shape index: {}]   ;;  %s1226_s10 = inlined_call_operand.vmem [shape: f32[1,256], index: 10, kind: input, shape index: {}]   ;;  %s1227_s11 = inlined_call_operand.vmem [shape: f32[1,256], index: 11, kind: input, shape index: {}]   ;;  %s1228_s12 = inlined_call_operand.vmem [shape: f32[1,2], index: 12, kind: input, shape index: {}]   ;;  %s1229_s13 = inlined_call_operand.vmem [shape: f32[16,1], index: 13, kind: output, shape index: {}]  }
   0x1 LB: > { %s829_s26 = sadd.s32 4294967295, %s977_s25   ;;  %p833_p0 = scmp.ge.s32.totalorder %s977_s25, 1  ;;  %s977_s25 = sphi %s1050_s25, %s23_s25  }
   0x2   : > { %p395_p1 = scmp.lt.s32.totalorder %s977_s25, 3 }
   0x4   : > { %p396_p2 = pnand %p833_p0, %p395_p1 }
   0x5   : > { %p441_p3 = scmp.lt.s32.totalorder (!%p396_p2), %s829_s26, 1 }
   0x6   : > { %399 = sbr.rel (%p396_p2) target bundleno = 803 (0x323), region = 72 }
   0xb   : > { %v839_v0 = vld [vmem:[%s1219_s3] sm:$0xf]  ;;  %v935_v1 = vld [vmem:[%s1219_s3] sm:$0x30]  ;;  %vm470_vm0 = vcmask 1045504   ;;  %vm491_vm1 = vcmask 1043456  }
   0xc   : > { %v840_v2 = vor.u32 %v935_v1, %v839_v0  ;;  %v458_v3 = vld [vmem:[%s1218_s2] sm:$0xf]  ;;  %v937_v4 = vld [vmem:[%s1221_s5 + $0x8] sm:$0xff]  ;;  %s1231_s26 = smov (!%p441_p3, %s829_s26), 1  ;;  %vm466_vm2 = vcmask 97280   ;;  %vm487_vm3 = vcmask 64512  }
   0xd   : > { %v493_v5 = vsel %vm491_vm1, %v458_v3, 0  ;;  %s1070_s18 = sshll.u32 %s1231_s26, 3  ;;  %v936_v11 = vld [vmem:[%s1221_s5] sm:$0xff]  ;;  %v941_v12 = vld [vmem:[%s1223_s7 + $0x18] sm:$0xff]  ;;  %v940_v13 = vld [vmem:[%s1223_s7 + $0x10] sm:$0xff]  ;;  %vm535_vm4 = vcmask 261120  }
   0xe   : > { %v472_v6 = vsel %vm470_vm0, %v840_v2, 0  ;;  %502 = vmatpush.bf16.msra.mxu3 %v493_v5  ;;  %s448_s21 = scalar_lea.vmem %s1217_s1, %s1070_s18  ;;  %s444_s24 = scalar_lea.vmem %s1216_s0, %s1070_s18  ;;  %v939_v14 = vld [vmem:[%s1223_s7 + $0x8] sm:$0xff]  ;;  %v967_v15 = vld [vmem:[%s1220_s4] ss:$0 sm:$0xff]  ;;  %v927_v25 = vld [vmem:[%s1225_s9 + $0x70] sm:$0xf] }
   0xf   : > { %481 = vmatpush.bf16.msra.mxu2 %v472_v6  ;;  %v456_v7 = vld [vmem:[%s448_s21] sm:$0xff]  ;;  %v957_v26 = vld [vmem:[%s1225_s9 + $0x74] sm:$0xf0]  ;;  %v956_v27 = vld [vmem:[%s1225_s9 + $0x74] sm:$0xf]  ;;  %vm590_vm5 = vcmask 523264  }
  0x10   : > { %v454_v8 = vld [vmem:[%s444_s24] sm:$0xff]  ;;  %v457_v9 = vpack.c.bf16 %v456_v7, %v456_v7  ;;  %v928_v28 = vor.u32 %v957_v26, %v927_v25  ;;  %v929_v29 = vld [vmem:[%s1225_s9 + $0x78] sm:$0xf0]  ;;  %v955_v31 = vld [vmem:[%s1225_s9 + $0x64] sm:$0xf0]  ;;  %s979_s21 = smov 127   ;;  %s452_s24 = scalar_lea.vmem %s1229_s13, %s1070_s18 }
  0x11   : > { %v455_v10 = vpack.c.bf16 %v454_v8, %v454_v8  ;;  %v938_v24 = vld [vmem:[%s1223_s7] sm:$0xff]  ;;  %v932_v32 = vor.u32 %v956_v27, %v929_v29  ;;  %v921_v34 = vld [vmem:[%s1225_s9 + $0x68] sm:$0xf0]  ;;  %v911_v37 = vld [vmem:[%s1225_s9 + $0x50] sm:$0xf]  ;;  %vm762_vm6 = vcmask 7168  }
  0x12   : > { %841 = vmatmul.msk.bf16.vlgmr.msra.gmra.mxu2 %vm466_vm2, %v457_v9  ;;  %598 = vmatpush.bf16.msrb.mxu3 %v941_v12  ;;  %v919_v30 = vld [vmem:[%s1225_s9 + $0x60] sm:$0xf]  ;;  %v954_v33 = vld [vmem:[%s1225_s9 + $0x64] sm:$0xf]  ;;  %v953_v38 = vld [vmem:[%s1225_s9 + $0x54] sm:$0xf0] }
  0x13   : > { %545 = vmatpush.bf16.msrb.mxu2 %v937_v4  ;;  %842 = vmatmul.msk.bf16.vlgmr.msra.gmra.mxu3 %vm487_vm3, %v455_v10  ;;  %v920_v35 = vor.u32 %v955_v31, %v919_v30  ;;  %v924_v36 = vor.u32 %v954_v33, %v921_v34  ;;  %v952_v39 = vld [vmem:[%s1225_s9 + $0x54] sm:$0xf]  ;;  %v913_v40 = vld [vmem:[%s1225_s9 + $0x58] sm:$0xf0]  ;;  %v912_v41 = vor.u32 %v953_v38, %v911_v37  ;;  %v903_v43 = vld [vmem:[%s1225_s9 + $0x40] sm:$0xf] }
  0x14   : > { %711 = vmatpush.bf16.msra.mxu0 %v928_v28  ;;  %724 = vmatpush.bf16.msra.mxu1 %v932_v32  ;;  %v916_v42 = vor.u32 %v952_v39, %v913_v40  ;;  %v951_v44 = vld [vmem:[%s1225_s9 + $0x44] sm:$0xf0]  ;;  %v950_v45 = vld [vmem:[%s1225_s9 + $0x44] sm:$0xf]  ;;  %v905_v46 = vld [vmem:[%s1225_s9 + $0x48] sm:$0xf0] }
  0x15   : > { %v904_v47 = vor.u32 %v951_v44, %v903_v43  ;;  %v908_v48 = vor.u32 %v950_v45, %v905_v46  ;;  %v895_v49 = vld [vmem:[%s1225_s9 + $0x30] sm:$0xf]  ;;  %v949_v50 = vld [vmem:[%s1225_s9 + $0x34] sm:$0xf0]  ;;  %v948_v51 = vld [vmem:[%s1225_s9 + $0x34] sm:$0xf] }
  0x16   : > { %599 = vmatpush.bf16.msrb.mxu3 %v940_v13  ;;  %v897_v52 = vld [vmem:[%s1225_s9 + $0x38] sm:$0xf0]  ;;  %v896_v53 = vor.u32 %v949_v50, %v895_v49  ;;  %v887_v55 = vld [vmem:[%s1225_s9 + $0x20] sm:$0xf]  ;;  %v947_v56 = vld [vmem:[%s1225_s9 + $0x24] sm:$0xf0] }
  0x17   : > { %546 = vmatpush.bf16.msrb.mxu2 %v936_v11  ;;  %v900_v54 = vor.u32 %v948_v51, %v897_v52  ;;  %v946_v57 = vld [vmem:[%s1225_s9 + $0x24] sm:$0xf]  ;;  %v889_v58 = vld [vmem:[%s1225_s9 + $0x28] sm:$0xf0]  ;;  %v888_v59 = vor.u32 %v947_v56, %v887_v55  ;;  %v968_v61 = vld [vmem:[%s1222_s6] ss:$0 sm:$0xff] }
  0x18   : > { %712 = vmatpush.bf16.msra.mxu0 %v920_v35  ;;  %725 = vmatpush.bf16.msra.mxu1 %v924_v36  ;;  %v892_v60 = vor.u32 %v946_v57, %v889_v58  ;;  %v879_v3 = vld [vmem:[%s1225_s9 + $0x10] sm:$0xf]  ;;  %v945_v4 = vld [vmem:[%s1225_s9 + $0x14] sm:$0xf0]  ;;  %v944_v5 = vld [vmem:[%s1225_s9 + $0x14] sm:$0xf] }
  0x19   : > { %v880_v6 = vor.u32 %v945_v4, %v879_v3  ;;  %v881_v7 = vld [vmem:[%s1225_s9 + $0x18] sm:$0xf0]  ;;  %v871_v9 = vld [vmem:[%s1225_s9] sm:$0xf]  ;;  %v943_v10 = vld [vmem:[%s1225_s9 + $0x4] sm:$0xf0] }
  0x1a   : > { %600 = vmatpush.bf16.msrb.mxu3 %v939_v14  ;;  %v884_v8 = vor.u32 %v944_v5, %v881_v7  ;;  %v942_v11 = vld [vmem:[%s1225_s9 + $0x4] sm:$0xf]  ;;  %v872_v12 = vor.u32 %v943_v10, %v871_v9  ;;  %v873_v13 = vld [vmem:[%s1225_s9 + $0x8] sm:$0xf0]  ;;  %v970_v37 = vld [vmem:[%s1228_s12] ss:$0 sm:$0xff] }
  0x1b   : > { %v876_v14 = vor.u32 %v942_v11, %v873_v13 }
  0x1c   : > { %713 = vmatpush.bf16.msra.mxu0 %v912_v41  ;;  %726 = vmatpush.bf16.msra.mxu1 %v916_v42 }
  0x1e   : > { %601 = vmatpush.bf16.msrb.mxu3 %v938_v24 }
  0x20   : > { %714 = vmatpush.bf16.msra.mxu0 %v904_v47  ;;  %727 = vmatpush.bf16.msra.mxu1 %v908_v48 }
  0x24   : > { %715 = vmatpush.bf16.msra.mxu0 %v896_v53  ;;  %728 = vmatpush.bf16.msra.mxu1 %v900_v54 }
  0x28   : > { %716 = vmatpush.bf16.msra.mxu0 %v888_v59  ;;  %729 = vmatpush.bf16.msra.mxu1 %v892_v60 }
  0x2c   : > { %717 = vmatpush.bf16.msra.mxu0 %v880_v6  ;;  %730 = vmatpush.bf16.msra.mxu1 %v884_v8 }
  0x30   : > { %718 = vmatpush.bf16.msra.mxu0 %v872_v12  ;;  %731 = vmatpush.bf16.msra.mxu1 %v876_v14 }
  0x95   : > { %v483_v16 = vpop.f32.mrf.mxu2 }
  0x96   : > { %v504_v17 = vpop.f32.mrf.mxu3 }
  0x97   : > { %v505_v18 = vadd.f32 %v504_v17, %v483_v16 }
  0x99   : > { %v512_v19 = vadd.f32 %v967_v15, %v505_v18  ;;  %v969_v15 = vld [vmem:[%s1224_s8] ss:$0 sm:$0xff] }
  0x9b   : > { %v513_v20 = vmax.f32 %v512_v19, 0.0 }
  0x9d   : > { %v514_v21 = vpack.c.bf16 %v513_v20, %v513_v20  ;;  %v485_v22 = vpop.f32.mrf.mxu2 }
  0x9e   : > { %v506_v23 = vpop.f32.mrf.mxu3 }
  0x9f   : > { %851 = vmatmul.msk.bf16.vlgmr.msrb.gmra.mxu2 %vm535_vm4, %v514_v21  ;;  %v625_v21 = vld [vmem:[%s1226_s10] sm:$0x3] }
  0xa0   : > { %v628_v22 = vperm.slane %v625_v21, 1  ;;  %v739_v23 = vld [vmem:[%s1227_s11] sm:$0x3]  ;;  %v627_v26 = vperm.slane %v625_v21, 0 }
  0xa1   : > { %v743_v28 = vperm.slane %v739_v23, 1  ;;  %v742_v35 = vperm.slane %v739_v23, 0 }
 0x122   : > { %v548_v62 = vpop.f32.mrf.mxu2 }
 0x123   : > { %v549_v63 = vadd.f32 %v968_v61, %v548_v62 }
 0x125   : > { %v552_v0 = vmax.f32 %v549_v63, 0.0 }
 0x127   : > { %v553_v1 = vpack.c.bf16 %v552_v0, %v552_v0 }
 0x129   : > { %868 = vmatmul.msk.bf16.vlgmr.msrb.gmra.mxu3 %vm590_vm5, %v553_v1 }
 0x12a   : > { %v550_v2 = vpop.f32.mrf.mxu2 }
 0x1ac   : > { %v603_v16 = vpop.f32.mrf.mxu3 }
 0x1ad   : > { %v604_v17 = vadd.f32 %v969_v15, %v603_v16 }
 0x1af   : > { %v607_v18 = vmax.f32 %v604_v17, 0.0 }
 0x1b1   : > { %v608_v19 = vpack.c.bf16 %v607_v18, %v607_v18 }
 0x1b3   : > { %719 = vmatmul.bf16.vlgmr.msra.gmra.mxu0 %v608_v19  ;;  %732 = vmatmul.bf16.vlgmr.msra.gmra.mxu1 %v608_v19 }
 0x1b4   : > { %v605_v20 = vpop.f32.mrf.mxu3 }
 0x230   : > { %v720_v24 = vpop.f32.mrf.mxu0  ;;  %v733_v25 = vpop.f32.mrf.mxu1 }
 0x231   : > { %v734_v27 = vadd.f32 %v733_v25, %v628_v22  ;;  %v721_v30 = vadd.f32 %v720_v24, %v627_v26 }
 0x233   : > { %v738_v29 = vmax.f32 %v734_v27, 0.0  ;;  %v737_v34 = vmax.f32 %v721_v30, 0.0 }
 0x235   : > { %v747_v31 = vmul.f32 %v743_v28, %v738_v29  ;;  %v746_v36 = vmul.f32 %v742_v35, %v737_v34 }
 0x237   : > { %754 = vadd.xlane.f32.xlu0 %v747_v31 }
 0x238   : > { %v722_v32 = vpop.f32.mrf.mxu0  ;;  %v735_v33 = vpop.f32.mrf.mxu1 }
 0x23f   : > { %748 = vadd.xlane.f32.xlu0 %v746_v36 }
 0x2aa   : > { %v755_v38 = vpop.xlane.xlu0 %754 }
 0x2ab   : > { %v756_v39 = vadd.f32 %v970_v37, %v755_v38 }
 0x2ad   : > { %758 = vrot.lane.b32.xlu1 %v756_v39, %s979_s21 }
 0x2b2   : > { %v749_v40 = vpop.xlane.xlu0 %748 }
 0x2b3   : > { %v753_v41 = vadd.f32 %v970_v37, %v749_v40 }
 0x31f   : > { %v759_v42 = vpop.permute.xlu1 %758 }
 0x320   : > { %v761_v43 = vmul.f32 %v759_v42, %v753_v41 }
 0x322   : > { %763 = vst.msk [vmem:[%s452_s24] sm:$0xff] %vm762_vm6, %v761_v43 }
 0x323 PF: > { %s23_s25 = sadd.s32 1, %s977_s25  }
 0x324   : > { %p20_p4 = scmp.ge.s32.totalorder %s23_s25, 4  }
 0x326   :  { %22 = sbr.rel (!%p20_p4) target bundleno = 1 (0x1), region = 105 }

</bundles_post_ra>
